<compile_context>
chip_gen: v5e
topology: v5e:2x2
jax: 0.10.0
libtpu: 0.0.40
codegen_flags: <defaults>
</compile_context>

<pallas_src>
import functools

import jax
import jax.numpy as jnp
from jax.experimental import pallas as pl
from jax.experimental.pallas import tpu as pltpu

EPS_BN = 1e-5
EPS_LN = 1e-5

KP_ORDER = (
    "w_stack", "w_gate",
    "w_a1", "b_a1", "ln_g", "ln_b",
    "w_la2", "b_fused",
    "w_psi", "b_psi",
)


def _gca_kernel(l_ref, g_ref,
                w_stack_ref, w_gate_ref,
                w_a1_ref, b_a1_ref, ln_g_ref, ln_b_ref,
                w_la2_ref, b_fused_ref,
                w_psi_ref, b_psi_ref,
                out_ref, *, ci, s_valid):
    """Blocks are (block_n, C, S) with S = padded H*W lane-dense.

    `ci` (static) = inter_channels; row `ci` of the stacked matmul output is the
    fused GCNet mask logits.  `s_valid` (static) = true H*W; lanes >= s_valid are
    zero padding and are masked out of the softmax pooling."""
    f32 = jnp.float32
    block_n, _, s_pad = l_ref.shape

    # Weights, loaded once per grid step (single-buffered constant blocks).
    w_stack = w_stack_ref[...]                      # (Cpad, Cl) bf16
    w_gate = w_gate_ref[...]                        # (Ci, Cg)   bf16
    w_a1 = w_a1_ref[...]                            # (Cr, Cl)   f32
    b_a1 = b_a1_ref[...]                            # (Cr, 1)
    ln_g = ln_g_ref[...]                            # (Cr, 1)
    ln_b = ln_b_ref[...]                            # (Cr, 1)
    w_la2 = w_la2_ref[...]                          # (Ci, Cr)
    b_fused = b_fused_ref[...]                      # (Ci, 1)
    w_psi = w_psi_ref[...]                          # (Ci, 1)
    b_psi = b_psi_ref[...]                          # (1, 1)

    if s_valid < s_pad:
        lane_ok = jax.lax.broadcasted_iota(jnp.int32, (1, s_pad), 1) < s_valid
    else:
        lane_ok = None

    for b in range(block_n):                        # small static batch block, unrolled
        x_in = l_ref[b]                             # (Cl, S), HBM I/O dtype
        g_in = g_ref[b]                             # (Cg, S)
        x32 = x_in.astype(f32)

        # Big MXU matmuls: bf16 operands, f32 accumulation.  Row `ci` of y is
        # the fused GCNet mask conv (feedback: no standalone 1-row matmul).
        y = jnp.dot(w_stack, x_in.astype(jnp.bfloat16),
                    preferred_element_type=f32)     # (Cpad, S)
        yg = jnp.dot(w_gate, g_in.astype(jnp.bfloat16),
                     preferred_element_type=f32)    # (Ci, S)

        # ---- GCNet attention pooling: softmax over HW, entirely on VPU/XLU --
        logits = y[ci:ci + 1, :]                    # (1, S); mask bias cancels in softmax
        m = jnp.max(logits, axis=-1, keepdims=True)
        e = jnp.exp(logits - m)                     # unnormalized weights
        if lane_ok is not None:
            e = jnp.where(lane_ok, e, 0.0)          # drop zero-padded pixels
        denom = jnp.sum(e, axis=-1, keepdims=True)  # (1, 1)
        inv = pl.reciprocal(denom, approx=True)     # EUP slot
        ctx = jnp.sum(x32 * e, axis=-1, keepdims=True) * inv      # (Cl, 1)

        # ---- channel_add transform (1x1 -> LayerNorm -> ReLU); the trailing
        #      1x1 and W_layer are pre-fused: bias = (W_layer@W_a2) t + b_fused
        t = jnp.dot(w_a1, ctx, preferred_element_type=f32) + b_a1  # (Cr, 1)
        mu = jnp.mean(t, axis=0, keepdims=True)
        var = jnp.mean(jnp.square(t - mu), axis=0, keepdims=True)
        t = (t - mu) * jax.lax.rsqrt(var + EPS_LN)
        t = jnp.maximum(t * ln_g + ln_b, 0.0)
        bias = jnp.dot(w_la2, t, preferred_element_type=f32) + b_fused  # (Ci, 1)

        # ---- gate: ReLU(W_layer(x+add) + W_gate g); psi 1-channel conv as a
        #      VPU multiply + sublane reduce (off the MXU) ---------------------
        p = jnp.maximum(y[:ci, :] + yg + bias, 0.0)                 # (Ci, S)
        psi_logit = jnp.sum(p * w_psi, axis=0, keepdims=True) + b_psi   # (1, S)
        psi = jax.nn.sigmoid(psi_logit)

        out_ref[b] = (x32 * psi).astype(out_ref.dtype)              # (Cl, S)


def _fold_bn(w, b, bn):
    """Fold eval-mode BatchNorm into the preceding 1x1 conv.
    w: (Cin, Cout), b: (Cout,); uses the full running stats."""
    scale = bn["gamma"] / jnp.sqrt(bn["var"] + EPS_BN)
    return w * scale[None, :], (b - bn["mean"]) * scale + bn["beta"]


def _prepare_kernel_params(p):
    f32 = jnp.float32
    w_layer, b_layer = _fold_bn(p["w_layer"].astype(f32), p["b_layer"].astype(f32), p["bn_layer"])
    w_gate, b_gate = _fold_bn(p["w_gate"].astype(f32), p["b_gate"].astype(f32), p["bn_gate"])
    w_psi, b_psi = _fold_bn(p["w_psi"].astype(f32), p["b_psi"].astype(f32), p["bn_psi"])

    wT_layer = w_layer.T                              # (Ci, Cl)
    wT_gate = w_gate.T                                # (Ci, Cg)
    wT_mask = p["w_mask"].astype(f32).T               # (1, Cl); bias dropped (softmax shift-inv.)
    ci, cl = wT_layer.shape

    # Fuse the mask conv as an extra output row of the W_layer matmul, padding
    # the row count to a sublane multiple.
    pad_rows = (-(ci + 1)) % 8
    w_stack = jnp.concatenate([wT_layer, wT_mask, jnp.zeros((pad_rows, cl), f32)], axis=0)

    # Fold channel_add -> W_layer:  W_layer^T (x + add) + biases
    #   = W_layer^T x + (W_layer^T W_a2^T) t + (W_layer^T b_a2 + b_layer + b_gate)
    wT_a2 = p["w_a2"].astype(f32).T                   # (Cl, Cr)
    w_la2 = wT_layer @ wT_a2                          # (Ci, Cr)
    b_fused = wT_layer @ p["b_a2"].astype(f32) + b_layer + b_gate   # (Ci,)

    def col(v):
        return jnp.reshape(v.astype(f32), (-1, 1))

    kp = {
        "w_stack": w_stack.astype(jnp.bfloat16),      # bf16 MXU operands (f32 accumulation)
        "w_gate": wT_gate.astype(jnp.bfloat16),
        "w_a1": p["w_a1"].astype(f32).T,              # (Cr, Cl)
        "b_a1": col(p["b_a1"]),
        "ln_g": col(p["ln_g"]),
        "ln_b": col(p["ln_b"]),
        "w_la2": w_la2,                               # (Ci, Cr)
        "b_fused": col(b_fused),                      # (Ci, 1)
        "w_psi": col(w_psi[:, 0]),                    # (Ci, 1): psi conv runs on the VPU
        "b_psi": col(b_psi),                          # (1, 1)
    }
    return kp, ci


def _vmem_budget():
    """Generation-aware per-step block budget + explicit scoped-VMEM limit."""
    try:
        cap = int(pltpu.get_tpu_info().vmem_capacity_bytes)
    except Exception:
        cap = 64 << 20                                # assume the small (v7x) size
    block_budget = (12 << 20) if cap >= (96 << 20) else (8 << 20)
    vmem_limit = int(min((cap * 3) // 4, 100 << 20))
    return block_budget, vmem_limit


def _pick_block_n(n, per_batch_bytes, budget):
    """Pack several batch elements per grid step (amortize ~0.35us/step) while
    keeping >= 2 grid steps and preferring an even step count (v7x: 2 TCs)."""
    feasible = []
    for bn in range(1, min(n, 8) + 1):
        if n % bn:
            continue
        if bn * per_batch_bytes > budget:
            continue
        if n >= 2 and n // bn < 2:
            continue
        feasible.append(bn)
    if not feasible:
        return 1
    even = [bn for bn in feasible if (n // bn) % 2 == 0]
    return max(even) if even else max(feasible)


def gated_context_attention(l_nchw, g_nchw, params, *, block_n=None):
    """l_nchw: (N, Cl, H, W), g_nchw: (N, Cg, H, W) -> (N, Cl, H, W).
    Output dtype matches l_nchw.dtype (bf16 HBM I/O supported; f32 accumulation).
    H*W is zero-padded to a multiple of 128 in the wrapper; the padding is
    masked out of the softmax pooling inside the kernel."""
    N, Cl, H, W = l_nchw.shape
    Cg = g_nchw.shape[1]
    HW = H * W
    S = ((HW + 127) // 128) * 128

    # Pure reshapes: NCHW is already channels-on-sublanes / pixels-on-lanes.
    l_flat = l_nchw.reshape(N, Cl, HW)
    g_flat = g_nchw.reshape(N, Cg, HW)
    if S != HW:
        l_flat = jnp.pad(l_flat, ((0, 0), (0, 0), (0, S - HW)))
        g_flat = jnp.pad(g_flat, ((0, 0), (0, 0), (0, S - HW)))

    kp, Ci = _prepare_kernel_params(params)
    weights = [kp[k] for k in KP_ORDER]

    block_budget, vmem_limit = _vmem_budget()
    if block_n is None:
        io_bytes = 2 * (2 * Cl + Cg) * S * l_flat.dtype.itemsize   # double-buffered l/g/out blocks
        f32_bytes = (2 * Cl + Cg + 2 * Ci + 16) * S * 4            # f32 in-kernel live set
        block_n = _pick_block_n(N, io_bytes + f32_bytes, block_budget)
    assert N % block_n == 0

    def batch_spec(c):
        return pl.BlockSpec((block_n, c, S), lambda n: (n, 0, 0))

    def const_spec(shape):
        zeros = (0,) * len(shape)
        # Constant index_map -> nothing to pipeline: single-buffer to halve the
        # weight VMEM footprint (matters on v7x's 64 MiB).
        return pl.BlockSpec(shape, lambda n, _z=zeros: _z,
                            pipeline_mode=pl.Buffered(1))

    in_specs = [batch_spec(Cl), batch_spec(Cg)] + [const_spec(w.shape) for w in weights]

    out_flat = pl.pallas_call(
        functools.partial(_gca_kernel, ci=Ci, s_valid=HW),
        out_shape=jax.ShapeDtypeStruct((N, Cl, S), l_flat.dtype),
        grid_spec=pltpu.PrefetchScalarGridSpec(
            num_scalar_prefetch=0,
            grid=(N // block_n,),
            in_specs=in_specs,
            out_specs=batch_spec(Cl),
        ),
        compiler_params=pltpu.CompilerParams(
            dimension_semantics=("parallel",),
            vmem_limit_bytes=vmem_limit),
    )(l_flat, g_flat, *weights)

    if S != HW:
        out_flat = out_flat[:, :, :HW]
    return out_flat.reshape(N, Cl, H, W)


def init_params(key, layer_channels, gate_channels, inter_channels, reduction=4):
    Cl, Cg, Ci = layer_channels, gate_channels, inter_channels
    Cr = max(Cl // reduction, 1)
    keys = iter(jax.random.split(key, 40))

    def nrm(shape, scale=0.1):
        return scale * jax.random.normal(next(keys), shape, dtype=jnp.float32)

    def bn_stats(c):
        # Eval-mode BatchNorm with non-trivial running stats (exercises the fold).
        return {
            "gamma": 1.0 + nrm((c,)),
            "beta": nrm((c,)),
            "mean": nrm((c,)),
            "var": 0.5 + jax.random.uniform(next(keys), (c,), dtype=jnp.float32),
        }

    return {
        # GlobalContext (GCNet) block on the layer input
        "w_mask": nrm((Cl, 1)), "b_mask": nrm((1,)),
        "w_a1": nrm((Cl, Cr)), "b_a1": nrm((Cr,)),
        "ln_g": 1.0 + nrm((Cr,)), "ln_b": nrm((Cr,)),
        "w_a2": nrm((Cr, Cl)), "b_a2": nrm((Cl,)),
        # W_layer / W_gate / psi: 1x1 conv + eval-mode BatchNorm
        "w_layer": nrm((Cl, Ci)), "b_layer": nrm((Ci,)), "bn_layer": bn_stats(Ci),
        "w_gate": nrm((Cg, Ci)), "b_gate": nrm((Ci,)), "bn_gate": bn_stats(Ci),
        "w_psi": nrm((Ci, 1)), "b_psi": nrm((1,)), "bn_psi": bn_stats(1),
    }


def _reference(l_nchw, g_nchw, p):
    # Pure-JAX reference (un-fused, BN applied explicitly in eval mode).
    N, Cl, H, W = l_nchw.shape
    Cg = g_nchw.shape[1]
    S = H * W
    x = l_nchw.reshape(N, Cl, S).astype(jnp.float32)
    g = g_nchw.reshape(N, Cg, S).astype(jnp.float32)

    def conv1x1(v, w, b):
        return jnp.einsum("io,nis->nos", w, v) + b[None, :, None]

    def bn_eval(v, bn):
        scale = bn["gamma"] / jnp.sqrt(bn["var"] + EPS_BN)
        return (v - bn["mean"][None, :, None]) * scale[None, :, None] + bn["beta"][None, :, None]

    # GlobalContext
    logits = conv1x1(x, p["w_mask"], p["b_mask"])                  # (N, 1, S)
    attn = jax.nn.softmax(logits, axis=-1)
    ctx = jnp.einsum("nis,nos->ni", x, attn)                       # (N, Cl)
    t = ctx @ p["w_a1"] + p["b_a1"]                                # (N, Cr)
    mu = jnp.mean(t, axis=-1, keepdims=True)
    var = jnp.mean((t - mu) ** 2, axis=-1, keepdims=True)
    t = (t - mu) / jnp.sqrt(var + EPS_LN) * p["ln_g"] + p["ln_b"]
    t = jnp.maximum(t, 0.0)
    add = t @ p["w_a2"] + p["b_a2"]                                # (N, Cl)
    l1 = x + add[:, :, None]

    l1p = bn_eval(conv1x1(l1, p["w_layer"], p["b_layer"]), p["bn_layer"])
    g1 = bn_eval(conv1x1(g, p["w_gate"], p["b_gate"]), p["bn_gate"])
    pin = jnp.maximum(g1 + l1p, 0.0)
    psi = jax.nn.sigmoid(bn_eval(conv1x1(pin, p["w_psi"], p["b_psi"]), p["bn_psi"]))
    out = x * psi
    return out.reshape(N, Cl, H, W).astype(l_nchw.dtype)


if __name__ == "__main__":
    N, Cl, Cg, Ci, H, W = 2, 16, 16, 16, 16, 16

    key = jax.random.PRNGKey(0)
    k_l, k_g = jax.random.split(key)
    l = jax.random.normal(k_l, (N, Cl, H, W), dtype=jnp.float32)
    g = jax.random.normal(k_g, (N, Cg, H, W), dtype=jnp.float32)
    params = init_params(jax.random.PRNGKey(42), Cl, Cg, Ci, reduction=4)

    # float32 I/O (bf16 MXU operands + approx reciprocal -> loosened tolerance).
    out = jax.block_until_ready(gated_context_attention(l, g, params))
    assert out.shape == (N, Cl, H, W) and out.dtype == jnp.float32
    ref = _reference(l, g, params)
    assert jnp.allclose(out, ref, atol=5e-2, rtol=5e-2), (
        f"f32 kernel mismatch vs reference: max err {float(jnp.max(jnp.abs(out - ref)))}")

    # bfloat16 HBM I/O (halves traffic for l/g/out; accumulation stays f32).
    l_bf = l.astype(jnp.bfloat16)
    g_bf = g.astype(jnp.bfloat16)
    out_bf = jax.block_until_ready(gated_context_attention(l_bf, g_bf, params))
    assert out_bf.dtype == jnp.bfloat16
    ref_bf = _reference(l_bf, g_bf, params).astype(jnp.float32)
    assert jnp.allclose(out_bf.astype(jnp.float32), ref_bf, atol=1e-1, rtol=1e-1), (
        "bf16 kernel mismatch vs reference")

    # Non-multiple-of-128 spatial size (exercises HW zero-pad + masked softmax).
    H2 = W2 = 12
    l2 = jax.random.normal(jax.random.PRNGKey(1), (N, Cl, H2, W2), dtype=jnp.float32)
    g2 = jax.random.normal(jax.random.PRNGKey(2), (N, Cg, H2, W2), dtype=jnp.float32)
    out2 = jax.block_until_ready(gated_context_attention(l2, g2, params))
    ref2 = _reference(l2, g2, params)
    assert out2.shape == (N, Cl, H2, W2)
    assert jnp.allclose(out2, ref2, atol=5e-2, rtol=5e-2), (
        f"padded-HW kernel mismatch: max err {float(jnp.max(jnp.abs(out2 - ref2)))}")

    print("KERNEL_OK")
</pallas_src>

<mosaic_0001>
module attributes {stable_mosaic.version = 11 : i64} {
  func.func @_gca_kernel(%arg0: i32, %arg1: memref<1x16x256xf32, #tpu.memory_space<vmem>>, %arg2: memref<1x16x256xf32, #tpu.memory_space<vmem>>, %arg3: memref<24x16xbf16, #tpu.memory_space<vmem>>, %arg4: memref<16x16xbf16, #tpu.memory_space<vmem>>, %arg5: memref<4x16xf32, #tpu.memory_space<vmem>>, %arg6: memref<4x1xf32, #tpu.memory_space<vmem>>, %arg7: memref<4x1xf32, #tpu.memory_space<vmem>>, %arg8: memref<4x1xf32, #tpu.memory_space<vmem>>, %arg9: memref<16x4xf32, #tpu.memory_space<vmem>>, %arg10: memref<16x1xf32, #tpu.memory_space<vmem>>, %arg11: memref<16x1xf32, #tpu.memory_space<vmem>>, %arg12: memref<1x1xf32, #tpu.memory_space<vmem>>, %arg13: memref<1x16x256xf32, #tpu.memory_space<vmem>>) attributes {dimension_semantics = [#tpu.dimension_semantics<parallel>], iteration_bounds = array<i64: 2>, scalar_prefetch = 0 : i64, scratch_operands = 0 : i64, tpu.core_type = #tpu.core_type<tc>, window_params = [{transform_indices = @transform_0, window_bounds = array<i64: 1, 16, 256>}, {transform_indices = @transform_1, window_bounds = array<i64: 1, 16, 256>}, {pipeline_mode = #tpu.pipeline_mode<synchronous>, transform_indices = @transform_2, window_bounds = array<i64: 24, 16>}, {pipeline_mode = #tpu.pipeline_mode<synchronous>, transform_indices = @transform_3, window_bounds = array<i64: 16, 16>}, {pipeline_mode = #tpu.pipeline_mode<synchronous>, transform_indices = @transform_4, window_bounds = array<i64: 4, 16>}, {pipeline_mode = #tpu.pipeline_mode<synchronous>, transform_indices = @transform_5, window_bounds = array<i64: 4, 1>}, {pipeline_mode = #tpu.pipeline_mode<synchronous>, transform_indices = @transform_6, window_bounds = array<i64: 4, 1>}, {pipeline_mode = #tpu.pipeline_mode<synchronous>, transform_indices = @transform_7, window_bounds = array<i64: 4, 1>}, {pipeline_mode = #tpu.pipeline_mode<synchronous>, transform_indices = @transform_8, window_bounds = array<i64: 16, 4>}, {pipeline_mode = #tpu.pipeline_mode<synchronous>, transform_indices = @transform_9, window_bounds = array<i64: 16, 1>}, {pipeline_mode = #tpu.pipeline_mode<synchronous>, transform_indices = @transform_10, window_bounds = array<i64: 16, 1>}, {pipeline_mode = #tpu.pipeline_mode<synchronous>, transform_indices = @transform_11, window_bounds = array<i64: 1, 1>}, {transform_indices = @transform_12, window_bounds = array<i64: 1, 16, 256>}]} {
    %c0 = arith.constant 0 : index
    %c0_0 = arith.constant 0 : index
    %0 = vector.load %arg3[%c0, %c0_0] : memref<24x16xbf16, #tpu.memory_space<vmem>>, vector<24x16xbf16>
    %c0_1 = arith.constant 0 : index
    %c0_2 = arith.constant 0 : index
    %1 = vector.load %arg4[%c0_1, %c0_2] : memref<16x16xbf16, #tpu.memory_space<vmem>>, vector<16x16xbf16>
    %c0_3 = arith.constant 0 : index
    %c0_4 = arith.constant 0 : index
    %2 = vector.load %arg5[%c0_3, %c0_4] : memref<4x16xf32, #tpu.memory_space<vmem>>, vector<4x16xf32>
    %c0_5 = arith.constant 0 : index
    %c0_6 = arith.constant 0 : index
    %3 = vector.load %arg6[%c0_5, %c0_6] : memref<4x1xf32, #tpu.memory_space<vmem>>, vector<4x1xf32>
    %c0_7 = arith.constant 0 : index
    %c0_8 = arith.constant 0 : index
    %4 = vector.load %arg7[%c0_7, %c0_8] : memref<4x1xf32, #tpu.memory_space<vmem>>, vector<4x1xf32>
    %c0_9 = arith.constant 0 : index
    %c0_10 = arith.constant 0 : index
    %5 = vector.load %arg8[%c0_9, %c0_10] : memref<4x1xf32, #tpu.memory_space<vmem>>, vector<4x1xf32>
    %c0_11 = arith.constant 0 : index
    %c0_12 = arith.constant 0 : index
    %6 = vector.load %arg9[%c0_11, %c0_12] : memref<16x4xf32, #tpu.memory_space<vmem>>, vector<16x4xf32>
    %c0_13 = arith.constant 0 : index
    %c0_14 = arith.constant 0 : index
    %7 = vector.load %arg10[%c0_13, %c0_14] : memref<16x1xf32, #tpu.memory_space<vmem>>, vector<16x1xf32>
    %c0_15 = arith.constant 0 : index
    %c0_16 = arith.constant 0 : index
    %8 = vector.load %arg11[%c0_15, %c0_16] : memref<16x1xf32, #tpu.memory_space<vmem>>, vector<16x1xf32>
    %c0_17 = arith.constant 0 : index
    %c0_18 = arith.constant 0 : index
    %9 = vector.load %arg12[%c0_17, %c0_18] : memref<1x1xf32, #tpu.memory_space<vmem>>, vector<1x1xf32>
    %c0_19 = arith.constant 0 : index
    %c0_20 = arith.constant 0 : index
    %c0_21 = arith.constant 0 : index
    %10 = vector.load %arg1[%c0_19, %c0_20, %c0_21] : memref<1x16x256xf32, #tpu.memory_space<vmem>>, vector<1x16x256xf32>
    %11 = vector.shape_cast %10 : vector<1x16x256xf32> to vector<16x256xf32>
    %c0_22 = arith.constant 0 : index
    %c0_23 = arith.constant 0 : index
    %c0_24 = arith.constant 0 : index
    %12 = vector.load %arg2[%c0_22, %c0_23, %c0_24] : memref<1x16x256xf32, #tpu.memory_space<vmem>>, vector<1x16x256xf32>
    %13 = vector.shape_cast %12 : vector<1x16x256xf32> to vector<16x256xf32>
    %14 = arith.truncf %11 : vector<16x256xf32> to vector<16x256xbf16>
    %cst = arith.constant dense<0.000000e+00> : vector<24x256xf32>
    %15 = tpu.matmul %0, %14, %cst {dimension_numbers = #tpu.dot_dimension_numbers<[1], [0], [0], [1], [0, 0, 1, 1], [], []>} : vector<24x16xbf16>, vector<16x256xbf16>, vector<24x256xf32> -> vector<24x256xf32>
    %16 = arith.truncf %13 : vector<16x256xf32> to vector<16x256xbf16>
    %cst_25 = arith.constant dense<0.000000e+00> : vector<16x256xf32>
    %17 = tpu.matmul %1, %16, %cst_25 {dimension_numbers = #tpu.dot_dimension_numbers<[1], [0], [0], [1], [0, 0, 1, 1], [], []>} : vector<16x16xbf16>, vector<16x256xbf16>, vector<16x256xf32> -> vector<16x256xf32>
    %18 = vector.extract_strided_slice %15 {offsets = [16, 0], sizes = [1, 256], strides = [1, 1]} : vector<24x256xf32> to vector<1x256xf32>
    %cst_26 = arith.constant dense<0xFF800000> : vector<1xf32>
    %19 = vector.multi_reduction <maximumf>, %18, %cst_26 [1] : vector<1x256xf32> to vector<1xf32>
    %20 = vector.shape_cast %19 : vector<1xf32> to vector<1x1xf32>
    %21 = vector.broadcast %20 : vector<1x1xf32> to vector<1x256xf32>
    %22 = arith.subf %18, %21 : vector<1x256xf32>
    %23 = math.exp %22 : vector<1x256xf32>
    %cst_27 = arith.constant dense<0.000000e+00> : vector<1xf32>
    %24 = vector.multi_reduction <add>, %23, %cst_27 [1] : vector<1x256xf32> to vector<1xf32>
    %25 = vector.shape_cast %24 : vector<1xf32> to vector<1x1xf32>
    %26 = tpu.reciprocal %25 {approx = true} : vector<1x1xf32> -> vector<1x1xf32>
    %27 = vector.broadcast %23 : vector<1x256xf32> to vector<16x256xf32>
    %28 = arith.mulf %11, %27 : vector<16x256xf32>
    %cst_28 = arith.constant dense<0.000000e+00> : vector<16xf32>
    %29 = vector.multi_reduction <add>, %28, %cst_28 [1] : vector<16x256xf32> to vector<16xf32>
    %30 = vector.shape_cast %29 : vector<16xf32> to vector<16x1xf32>
    %31 = vector.broadcast %26 : vector<1x1xf32> to vector<16x1xf32>
    %32 = arith.mulf %30, %31 : vector<16x1xf32>
    %cst_29 = arith.constant dense<0.000000e+00> : vector<4x1xf32>
    %33 = tpu.matmul %2, %32, %cst_29 {dimension_numbers = #tpu.dot_dimension_numbers<[1], [0], [0], [1], [0, 0, 1, 1], [], []>} : vector<4x16xf32>, vector<16x1xf32>, vector<4x1xf32> -> vector<4x1xf32>
    %34 = arith.addf %33, %3 : vector<4x1xf32>
    %cst_30 = arith.constant dense<0.000000e+00> : vector<1xf32>
    %35 = vector.multi_reduction <add>, %34, %cst_30 [0] : vector<4x1xf32> to vector<1xf32>
    %36 = vector.shape_cast %35 : vector<1xf32> to vector<1x1xf32>
    %cst_31 = arith.constant 4.000000e+00 : f32
    %37 = vector.broadcast %cst_31 : f32 to vector<1x1xf32>
    %38 = arith.divf %36, %37 : vector<1x1xf32>
    %39 = vector.broadcast %38 : vector<1x1xf32> to vector<4x1xf32>
    %40 = arith.subf %34, %39 : vector<4x1xf32>
    %41 = arith.mulf %40, %40 : vector<4x1xf32>
    %cst_32 = arith.constant dense<0.000000e+00> : vector<1xf32>
    %42 = vector.multi_reduction <add>, %41, %cst_32 [0] : vector<4x1xf32> to vector<1xf32>
    %43 = vector.shape_cast %42 : vector<1xf32> to vector<1x1xf32>
    %cst_33 = arith.constant 4.000000e+00 : f32
    %44 = vector.broadcast %cst_33 : f32 to vector<1x1xf32>
    %45 = arith.divf %43, %44 : vector<1x1xf32>
    %46 = vector.broadcast %38 : vector<1x1xf32> to vector<4x1xf32>
    %47 = arith.subf %34, %46 : vector<4x1xf32>
    %cst_34 = arith.constant 9.99999974E-6 : f32
    %48 = vector.broadcast %cst_34 : f32 to vector<1x1xf32>
    %49 = arith.addf %45, %48 : vector<1x1xf32>
    %50 = math.rsqrt %49 : vector<1x1xf32>
    %51 = vector.broadcast %50 : vector<1x1xf32> to vector<4x1xf32>
    %52 = arith.mulf %47, %51 : vector<4x1xf32>
    %53 = arith.mulf %52, %4 : vector<4x1xf32>
    %54 = arith.addf %53, %5 : vector<4x1xf32>
    %cst_35 = arith.constant 0.000000e+00 : f32
    %55 = vector.broadcast %cst_35 : f32 to vector<4x1xf32>
    %56 = arith.maximumf %54, %55 : vector<4x1xf32>
    %cst_36 = arith.constant dense<0.000000e+00> : vector<16x1xf32>
    %57 = tpu.matmul %6, %56, %cst_36 {dimension_numbers = #tpu.dot_dimension_numbers<[1], [0], [0], [1], [0, 0, 1, 1], [], []>} : vector<16x4xf32>, vector<4x1xf32>, vector<16x1xf32> -> vector<16x1xf32>
    %58 = arith.addf %57, %7 : vector<16x1xf32>
    %59 = vector.extract_strided_slice %15 {offsets = [0, 0], sizes = [16, 256], strides = [1, 1]} : vector<24x256xf32> to vector<16x256xf32>
    %60 = arith.addf %59, %17 : vector<16x256xf32>
    %61 = vector.broadcast %58 : vector<16x1xf32> to vector<16x256xf32>
    %62 = arith.addf %60, %61 : vector<16x256xf32>
    %cst_37 = arith.constant 0.000000e+00 : f32
    %63 = vector.broadcast %cst_37 : f32 to vector<16x256xf32>
    %64 = arith.maximumf %62, %63 : vector<16x256xf32>
    %65 = vector.broadcast %8 : vector<16x1xf32> to vector<16x256xf32>
    %66 = arith.mulf %64, %65 : vector<16x256xf32>
    %cst_38 = arith.constant dense<0.000000e+00> : vector<256xf32>
    %67 = vector.multi_reduction <add>, %66, %cst_38 [0] : vector<16x256xf32> to vector<256xf32>
    %68 = vector.shape_cast %67 : vector<256xf32> to vector<1x256xf32>
    %69 = vector.broadcast %9 : vector<1x1xf32> to vector<1x256xf32>
    %70 = arith.addf %68, %69 : vector<1x256xf32>
    %71 = arith.negf %70 : vector<1x256xf32>
    %72 = math.exp %71 : vector<1x256xf32>
    %cst_39 = arith.constant 1.000000e+00 : f32
    %73 = vector.broadcast %cst_39 : f32 to vector<1x256xf32>
    %74 = arith.addf %73, %72 : vector<1x256xf32>
    %75 = arith.divf %73, %74 : vector<1x256xf32>
    %76 = vector.broadcast %75 : vector<1x256xf32> to vector<16x256xf32>
    %77 = arith.mulf %11, %76 : vector<16x256xf32>
    %c0_40 = arith.constant 0 : index
    %c0_41 = arith.constant 0 : index
    %c0_42 = arith.constant 0 : index
    %78 = vector.load %arg13[%c0_40, %c0_41, %c0_42] : memref<1x16x256xf32, #tpu.memory_space<vmem>>, vector<1x16x256xf32>
    %79 = vector.shape_cast %78 : vector<1x16x256xf32> to vector<16x256xf32>
    %80 = vector.shape_cast %77 : vector<16x256xf32> to vector<1x16x256xf32>
    tpu.vector_store %arg13[%c0_40, %c0_41, %c0_42], %80 {strides = array<i32>} : memref<1x16x256xf32, #tpu.memory_space<vmem>>, vector<1x16x256xf32>,
    return
  }
  func.func @transform_0(%arg0: i32) -> (i32, i32, i32) {
    %c0_i32 = arith.constant 0 : i32
    %c0_i32_0 = arith.constant 0 : i32
    %c0_i32_1 = arith.constant 0 : i32
    return %arg0, %c0_i32, %c0_i32_0 : i32, i32, i32
  }
  func.func @transform_1(%arg0: i32) -> (i32, i32, i32) {
    %c0_i32 = arith.constant 0 : i32
    %c0_i32_0 = arith.constant 0 : i32
    %c0_i32_1 = arith.constant 0 : i32
    return %arg0, %c0_i32, %c0_i32_0 : i32, i32, i32
  }
  func.func @transform_2(%arg0: i32) -> (i32, i32) {
    %c0_i32 = arith.constant 0 : i32
    %c0_i32_0 = arith.constant 0 : i32
    %c0_i32_1 = arith.constant 0 : i32
    return %c0_i32, %c0_i32_0 : i32, i32
  }
  func.func @transform_3(%arg0: i32) -> (i32, i32) {
    %c0_i32 = arith.constant 0 : i32
    %c0_i32_0 = arith.constant 0 : i32
    %c0_i32_1 = arith.constant 0 : i32
    return %c0_i32, %c0_i32_0 : i32, i32
  }
  func.func @transform_4(%arg0: i32) -> (i32, i32) {
    %c0_i32 = arith.constant 0 : i32
    %c0_i32_0 = arith.constant 0 : i32
    %c0_i32_1 = arith.constant 0 : i32
    return %c0_i32, %c0_i32_0 : i32, i32
  }
  func.func @transform_5(%arg0: i32) -> (i32, i32) {
    %c0_i32 = arith.constant 0 : i32
    %c0_i32_0 = arith.constant 0 : i32
    %c0_i32_1 = arith.constant 0 : i32
    return %c0_i32, %c0_i32_0 : i32, i32
  }
  func.func @transform_6(%arg0: i32) -> (i32, i32) {
    %c0_i32 = arith.constant 0 : i32
    %c0_i32_0 = arith.constant 0 : i32
    %c0_i32_1 = arith.constant 0 : i32
    return %c0_i32, %c0_i32_0 : i32, i32
  }
  func.func @transform_7(%arg0: i32) -> (i32, i32) {
    %c0_i32 = arith.constant 0 : i32
    %c0_i32_0 = arith.constant 0 : i32
    %c0_i32_1 = arith.constant 0 : i32
    return %c0_i32, %c0_i32_0 : i32, i32
  }
  func.func @transform_8(%arg0: i32) -> (i32, i32) {
    %c0_i32 = arith.constant 0 : i32
    %c0_i32_0 = arith.constant 0 : i32
    %c0_i32_1 = arith.constant 0 : i32
    return %c0_i32, %c0_i32_0 : i32, i32
  }
  func.func @transform_9(%arg0: i32) -> (i32, i32) {
    %c0_i32 = arith.constant 0 : i32
    %c0_i32_0 = arith.constant 0 : i32
    %c0_i32_1 = arith.constant 0 : i32
    return %c0_i32, %c0_i32_0 : i32, i32
  }
  func.func @transform_10(%arg0: i32) -> (i32, i32) {
    %c0_i32 = arith.constant 0 : i32
    %c0_i32_0 = arith.constant 0 : i32
    %c0_i32_1 = arith.constant 0 : i32
    return %c0_i32, %c0_i32_0 : i32, i32
  }
  func.func @transform_11(%arg0: i32) -> (i32, i32) {
    %c0_i32 = arith.constant 0 : i32
    %c0_i32_0 = arith.constant 0 : i32
    %c0_i32_1 = arith.constant 0 : i32
    return %c0_i32, %c0_i32_0 : i32, i32
  }
  func.func @transform_12(%arg0: i32) -> (i32, i32, i32) {
    %c0_i32 = arith.constant 0 : i32
    %c0_i32_0 = arith.constant 0 : i32
    %c0_i32_1 = arith.constant 0 : i32
    return %arg0, %c0_i32, %c0_i32_0 : i32, i32, i32
  }
}

</mosaic_0001>

<bundles_post_ra>
// kernel: tpu_custom_call.1
= control target key start
LH: loop header
LB: loop body
LE: loop exit
PB: predicated region body
PF: predicated region fallthrough
CT: control target
= control target key end

     0   :  { %s1528_s0 = inlined_call_operand.hbm [shape: f32[2,16,256], index: 0, kind: input, shape index: {}]   ;;  %s1529_s1 = inlined_call_operand.hbm [shape: f32[2,16,256], index: 1, kind: input, shape index: {}]   ;;  %s1530_s2 = inlined_call_operand.vmem [shape: bf16[24,16], index: 2, kind: input, shape index: {}]   ;;  %s1531_s3 = inlined_call_operand.vmem [shape: bf16[16,16], index: 3, kind: input, shape index: {}]   ;;  %s1532_s4 = inlined_call_operand.vmem [shape: f32[4,16], index: 4, kind: input, shape index: {}]   ;;  %s1533_s5 = inlined_call_operand.vmem [shape: f32[4,1], index: 5, kind: input, shape index: {}]   ;;  %s1534_s6 = inlined_call_operand.vmem [shape: f32[4,1], index: 6, kind: input, shape index: {}]   ;;  %s1535_s7 = inlined_call_operand.vmem [shape: f32[4,1], index: 7, kind: input, shape index: {}]   ;;  %s1536_s8 = inlined_call_operand.vmem [shape: f32[16,4], index: 8, kind: input, shape index: {}]   ;;  %s1537_s9 = inlined_call_operand.vmem [shape: f32[16,1], index: 9, kind: input, shape index: {}]   ;;  %s1538_s10 = inlined_call_operand.vmem [shape: f32[16,1], index: 10, kind: input, shape index: {}]   ;;  %s1539_s11 = inlined_call_operand.<no memory space> [shape: f32[1,1], index: 11, kind: input, shape index: {}]   ;;  %s1540_s12 = inlined_call_operand.hbm [shape: f32[2,16,256], index: 12, kind: output, shape index: {}]  }
   0x1   :  { %1552 = sst [smem:[#allocation19_spill]] %s1528_s0  ;;  %v17_v0 = vstv %s1539_s11 }
   0x2   :  { %1553 = sst [smem:[#allocation20_spill]] %s1540_s12  ;;  %18 = vst [vmem:[#allocation2] sm:$0x1] %v17_v0 }
   0x3   :  { %19 = vsyncpa [#allocation4], 0 }
   0x4   :  { %21 = vsyncpa [#allocation4 + $0x1], 0 }
   0x5   :  { %22 = vsyncpa [#allocation7], 0 }
   0x6   :  { %24 = vsyncpa [#allocation7 + $0x1], 0 }
   0x7   :  { %25 = vsyncpa [#allocation5], 0 }
   0x8   :  { %27 = vsyncpa [#allocation5 + $0x1], 0  ;;  %s1268_s23 = smov 0   ;;  %s1270_s24 = smov 0  }
   0x9   :  { %s1272_s25 = smov 0   ;;  %s1274_s26 = smov 0  }
   0xa LB: > { %1554 = sst [smem:[#allocation12_spill]] %s1180_s23  ;;  %s1289_s11 = sadd.s32 4294967295, %s1192_s26   ;;  %s1192_s26 = sphi %s1274_s26, %s1576_s26   ;;  %s1188_s25 = sphi %s1272_s25, %s1578_s25   ;;  %s1184_s24 = sphi %s1270_s24, %s1580_s24   ;;  %s1180_s23 = sphi %s1268_s23, %s1579_s23  }
   0xb   : > { %1555 = sst [smem:[#allocation13_spill]] %s1188_s25  ;;  %s941_s27 = sadd.s32 4294967294, %s1192_s26  }
   0xc   : > { %1556 = sst [smem:[#allocation14_spill]] %s1289_s11  ;;  %s1293_s28 = sadd.s32 1, %s1192_s26  }
   0xd   : > { %1557 = sst [smem:[#allocation15_spill]] %s1293_s28  ;;  %s40_s29 = sadd.s32 1, %s1188_s25 }
   0xe   : > { %s37_s30 = ssub.s32 %s1192_s26, %s1293_s28  ;;  %p47_p0 = scmp.ne.s32.totalorder %s1188_s25, %s1184_s24 }
   0xf   : > { %p38_p1 = scmp.eq.s32.totalorder %s37_s30, 0  ;;  %p48_p2 = scmp.eq.s32.totalorder %s1192_s26, 0 }
  0x10   : > { %p53_p3 = scmp.ne.s32.totalorder %s1184_s24, %s1180_s23  ;;  %p54_p4 = scmp.eq.s32.totalorder %s1289_s11, 0 }
  0x11   : > { %s1305_s13 = scalar_select %p38_p1, %s1188_s25, %s40_s29  }
  0x12   : > { %p1307_p5 = por %p48_p2, %p47_p0  ;;  %p1311_p6 = por %p54_p4, %p53_p3 }
  0x13   : > { %1558 = sst [smem:[#allocation16_spill]] %s1305_s13  ;;  %p313_p7 = scmp.eq.s32.totalorder %s1289_s11, 1 }
  0x14   : > { %p319_p8 = scmp.eq.s32.totalorder %s941_s27, 1  ;;  %p1001_p10 = scmp.lt.s32.totalorder %s1192_s26, 2 }
  0x15   : > { %p1318_p11 = por %p313_p7, %p47_p0  ;;  %s1327_s18 = sand.u32 1, %s1188_s25  }
  0x16   : > { %p1322_p12 = por %p319_p8, %p53_p3  ;;  %s1546_s19 = sshll.u32 %s1192_s26, 5 }
  0x17   : > { %s1561_s16 = scalar_select %p1318_p11, 1, 0 }
  0x18   : > { %s1563_s17 = scalar_select %p1322_p12, 1, 0 }
  0x19   : > { %1562 = sst [smem:[#allocation17_spill]] %s1561_s16  ;;  %s1545_s20 = sshll.u32 %s1327_s18, 5 }
  0x1a   : > { %1564 = sst [smem:[#allocation18_spill]] %s1563_s17  ;;  %s373_s30 = scalar_lea.vmem [#allocation3], %s1545_s20 }
  0x1b   : > { %s1565_s0 = sld [smem:[#allocation19_spill]]  ;;  %s381_s13 = sshll.u32 %s373_s30, 4  ;;  %s382_s13 = int_to_ptr.vmem [resolvable:$true] %s381_s13 }
  0x1c   : > { %p1340_p13 = pnand %p1001_p10, %p1307_p5  ;;  %p950_p0 = scmp.ge.s32.totalorder %s1192_s26, 1 }
  0x1d   : > { %p411_p1 = scmp.lt.s32.totalorder %s1192_s26, 3  ;;  %s370_s28 = scalar_lea.sflag [#allocation4], %s1327_s18 }
  0x1e   : > { %p1066_p3 = pneg %p1340_p13 }
  0x21   : > { %s378_s27 = scalar_lea.hbm %s1565_s0, %s1546_s19 }
  0x22   : > { %s379_s29 = sshll.u32 %s378_s27, 4  ;;  %s1069_s27 = scalar_lea.hbm %s1565_s0, 64  ;;  %s380_s29 = int_to_ptr.hbm [resolvable:$true] %s379_s29 }
  0x23   : > { %s1062_s17 = sshra.s32 %s380_s29, 4  ;;  %s1063_s17 = int_to_ptr.hbm [resolvable:$true] %s1062_s17 }
  0x24   : > { %s1064_s21 = scalar_lea.hbm %s1063_s17, 32  ;;  %p1070_p5 = scmp.lt.s32.totalorder %s1063_s17, %s1565_s0 }
  0x25   : > { %p1065_p2 = scmp.ne.s32.totalorder %s1063_s17, %s1064_s21  ;;  %p1071_p8 = scmp.lt.s32.totalorder %s1069_s27, %s1064_s21 }
  0x27   : > { %p1067_p4 = pnand %p1066_p3, %p1065_p2  ;;  %p1072_p10 = por %p1071_p8, %p1070_p5 }
  0x29   : > { %p1068_p7 = pneg %p1067_p4 }
  0x2b   : > { %p1073_p9 = pnand %p1072_p10, %p1068_p7 }
  0x2d   : > { %1076 = shalt.err (!%p1073_p9)
}
  0x2e   : > { %s1194_s19 = smov 256   ;;  %s1195_s23 = smov 16  }
  0x2f   : > { %993 = dma.hbm_to_vmem [thread:$0]  (!%p1340_p13), %s380_s29, 512, %s382_s13, %s370_s28, %s1194_s19, %s1194_s19, %s1195_s23  }
  0x30   : > { %p1364_p2 = pnand %p950_p0, %p411_p1  ;;  %s1568_s17 = sshll.u32 %s1192_s26, 5 }
  0x31   : > { %s400_s22 = scalar_lea.hbm %s1529_s1, %s1568_s17  ;;  %s1569_s30 = sshll.u32 %s1327_s18, 5 }
  0x32   : > { %s401_s27 = sshll.u32 %s400_s22, 4  ;;  %s395_s0 = scalar_lea.vmem [#allocation6], %s1569_s30  ;;  %s402_s27 = int_to_ptr.hbm [resolvable:$true] %s401_s27 }
  0x33   : > { %s403_s16 = sshll.u32 %s395_s0, 4  ;;  %s392_s12 = scalar_lea.sflag [#allocation7], %s1327_s18  ;;  %s404_s16 = int_to_ptr.vmem [resolvable:$true] %s403_s16 }
  0x34   : > { %s1092_s11 = sshra.s32 %s402_s27, 4  ;;  %s1099_s21 = scalar_lea.hbm %s1529_s1, 64  ;;  %s1093_s11 = int_to_ptr.hbm [resolvable:$true] %s1092_s11 }
  0x35   : > { %s1094_s28 = scalar_lea.hbm %s1093_s11, 32  ;;  %p1100_p4 = scmp.lt.s32.totalorder %s1093_s11, %s1529_s1 }
  0x36   : > { %p1095_p9 = scmp.ne.s32.totalorder %s1093_s11, %s1094_s28  ;;  %p1101_p7 = scmp.lt.s32.totalorder %s1099_s21, %s1094_s28 }
  0x38   : > { %p1097_p0 = pnand %p1095_p9, %p1066_p3  ;;  %p1102_p5 = por %p1101_p7, %p1100_p4 }
  0x3a   : > { %p1098_p1 = pneg %p1097_p0 }
  0x3c   : > { %p1103_p8 = pnand %p1102_p5, %p1098_p1 }
  0x3e   : > { %1106 = shalt.err (!%p1103_p8)
}
  0x3f   : > { %996 = dma.hbm_to_vmem [thread:$0]  (!%p1340_p13), %s402_s27, 512, %s404_s16, %s392_s12, %s1194_s19, %s1194_s19, %s1195_s23  }
  0x40   : > { %415 = sbr.rel (%p1364_p2) target bundleno = 974 (0x3ce), region = 68  ;;  %s1390_s0 = sand.u32 (!%p1364_p2), 1, %s1184_s24  }
  0x41   : > { %s1393_s18 = sshll.u32 (!%p1364_p2), %s1390_s0, 5  ;;  %s418_s11 = scalar_lea.sflag (!%p1364_p2), [#allocation4], %s1390_s0 }
  0x42   : > { %s421_s22 = scalar_lea.vmem (!%p1364_p2), [#allocation3], %s1393_s18 }
  0x45   : > { %1167 = dma.done.wait (%p1311_p6), %s418_s11, 512  }
  0x46   : > { %1169 = vsyncadd (%p1311_p6), %s418_s11, 4294966784  ;;  %s428_s12 = scalar_lea.sflag [#allocation7], %s1390_s0  ;;  %s431_s23 = scalar_lea.vmem [#allocation6], %s1393_s18 }
  0x47   : > { %1171 = dma.done.wait (%p1311_p6), %s428_s12, 512  }
  0x48   : > { %1173 = vsyncadd (%p1311_p6), %s428_s12, 4294966784  ;;  %v1407_v1 = vld [vmem:[%s421_s22] sm:$0xff]  ;;  %v1409_v2 = vld [vmem:[%s421_s22 + $0x10] sm:$0xff]  ;;  %vm513_vm0 = vcmask 130048   ;;  %vm594_vm1 = vcmask 1040384   ;;  %v1196_v59 = vmov 4.0  }
  0x49   : > { %v1411_v3 = vld [vmem:[%s421_s22 + $0x8] sm:$0xff]  ;;  %v503_v4 = vpack.c.bf16 %v1409_v2, %v1407_v1  ;;  %v1415_v5 = vld [vmem:[%s421_s22 + $0x18] sm:$0xff]  ;;  %v499_v6 = vld [vmem:[%s431_s23] sm:$0xff]  ;;  %vm650_vm2 = vcmask 3072   ;;  %vm698_vm7 = vcmask 1043456   ;;  %vm691_vm8 = vcmask 31744  }
  0x4a   : > { %v501_v7 = vld [vmem:[%s431_s23 + $0x10] sm:$0xff]  ;;  %v504_v8 = vpack.c.bf16 %v1415_v5, %v1411_v3  ;;  %v500_v10 = vld [vmem:[%s431_s23 + $0x8] sm:$0xff]  ;;  %v502_v11 = vld [vmem:[%s431_s23 + $0x18] sm:$0xff]  ;;  %s1570_s29 = sld [smem:[#allocation14_spill]]  ;;  %s477_s12 = scalar_lea.vmem [#allocation8], %s1393_s18 }
  0x4b   : > { %v556_v9 = vpack.c.bf16 %v501_v7, %v499_v6  ;;  %v981_v12 = vld [vmem:[%s1530_s2] sm:$0xff]  ;;  %527 = vmatpush.bf16.msra.mxu0 %v503_v4  ;;  %v557_v13 = vpack.c.bf16 %v502_v11, %v500_v10  ;;  %v481_v15 = vld [vmem:[%s1530_s2 + $0x8] sm:$0xf]  ;;  %s1571_s11 = sld [smem:[#allocation20_spill]]  ;;  %s842_s23 = sshll.u32 %s477_s12, 4  ;;  %s843_s23 = int_to_ptr.vmem [resolvable:$true] %s842_s23 }
  0x4c   : > { %v982_v14 = vld [vmem:[%s1531_s3] sm:$0xff]  ;;  %545 = vmatpush.bf16.msra.mxu1 %v504_v8  ;;  %v510_v16 = vunpack.c.l.b16 %v481_v15  ;;  %s830_s16 = scalar_lea.sflag [#allocation5], %s1390_s0 }
  0x4d   : > { %573 = vmatpush.bf16.msra.mxu2 %v556_v9  ;;  %587 = vmatpush.bf16.msra.mxu3 %v557_v13  ;;  %v484_v58 = vld [vmem:[%s1532_s4] sm:$0xf] }
  0x4e   : > { %958 = vmatmul.msk.bf16.vlgmr.msra.gmra.mxu0 %vm513_vm0, %v981_v12  ;;  %v512_v17 = vpack.c.b16 %v510_v16, %v510_v16  ;;  %v485_v63 = vld [vmem:[%s1533_s5] sm:$0xf] }
  0x4f   : > { %960 = vmatmul.msk.bf16.vlgmr.msra.gmra.mxu1 %vm513_vm0, %v981_v12 }
  0x50   : > { %966 = vmatmul.msk.bf16.vlgmr.msra.gmra.mxu2 %vm513_vm0, %v982_v14  ;;  %967 = vmatmul.msk.bf16.vlgmr.msra.gmra.mxu3 %vm513_vm0, %v982_v14  ;;  %s983_s21 = sshll.u32 %s1570_s29, 5 }
  0x51   : > { %s841_s22 = scalar_lea.hbm %s1571_s11, %s983_s21  ;;  %s1142_s30 = scalar_lea.hbm %s1571_s11, 64 }
  0x52   : > { %s844_s25 = sshll.u32 %s841_s22, 4  ;;  %s845_s25 = int_to_ptr.hbm [resolvable:$true] %s844_s25 }
  0x53   : > { %s1136_s18 = sshra.s32 %s845_s25, 4  ;;  %s1137_s18 = int_to_ptr.hbm [resolvable:$true] %s1136_s18 }
  0x54   : > { %s1138_s19 = scalar_lea.hbm %s1137_s18, 32  ;;  %p1143_p10 = scmp.lt.s32.totalorder %s1137_s18, %s1571_s11 }
  0x55   : > { %p1139_p6 = scmp.ne.s32.totalorder %s1137_s18, %s1138_s19  ;;  %p1144_p2 = scmp.lt.s32.totalorder %s1142_s30, %s1138_s19 }
  0x57   : > { %p1140_p13 = pnand %p1139_p6, %p1318_p11  ;;  %p1145_p9 = por %p1144_p2, %p1143_p10 }
  0x59   : > { %p1141_p3 = pneg %p1140_p13 }
  0x5b   : > { %p1146_p0 = pnand %p1145_p9, %p1141_p3 }
  0x5e   : > { %959 = vmatmul.msk.bf16.gmra.mxu0 %vm513_vm0, %v512_v17 }
  0x5f   : > { %961 = vmatmul.msk.bf16.gmra.mxu1 %vm513_vm0, %v512_v17 }
  0xcb   : > { %v529_v18 = vpop.f32.mrf.mxu0 }
  0xcc   : > { %v547_v19 = vpop.f32.mrf.mxu1 }
  0xd3   : > { %v575_v20 = vpop.f32.mrf.mxu2  ;;  %v589_v22 = vpop.f32.mrf.mxu3 }
  0xd4   : > { %v1434_v21 = vadd.f32 %v575_v20, %v529_v18  ;;  %v1436_v23 = vpop.f32.mrf.mxu0  ;;  %v1438_v24 = vadd.f32 %v589_v22, %v547_v19  ;;  %v1440_v25 = vpop.f32.mrf.mxu1 }
  0xdb   : > { %v1454_v60 = vpop.f32.mrf.mxu2 }
  0xdc   : > { %v534_v26 = vpop.f32.mrf.mxu0  ;;  %v552_v27 = vpop.f32.mrf.mxu1 }
  0xdd   : > { %v595_v28 = vsel %vm594_vm1, %v534_v26, -inf  ;;  %v596_v29 = vsel %vm594_vm1, %v552_v27, -inf }
  0xde   : > { %v597_v30 = vmax.f32 %v595_v28, %v596_v29 }
  0xe0   : > { %598 = vmax.xlane.f32.xlu0 %v597_v30 }
  0xe4   : > { %v536_v31 = vpop.f32.mrf.mxu0  ;;  %v554_v32 = vpop.f32.mrf.mxu1 }
 0x153   : > { %v599_v33 = vpop.xlane.xlu0 %598 }
 0x154   : > { %v600_v34 = vsub.f32 %v534_v26, %v599_v33  ;;  %v601_v35 = vsub.f32 %v552_v27, %v599_v33  ;;  %v492_v33 = vld [vmem:[%s1538_s10] sm:$0xff] }
 0x156   : > { %v602_v36 = vmul.f32 1.442695, %v600_v34  ;;  %v604_v37 = vmul.f32 1.442695, %v601_v35  ;;  %v493_v34 = vld [vmem:[%s1538_s10 + $0x8] sm:$0xff]  ;;  %v1197_v35 = vmov 0  }
 0x157   : > { %1042 = vset.pattern.permute.xlu0 %v1197_v35  ;;  %1043 = vset.pattern.permute.xlu1 %v1197_v35 }
 0x158   : > { %1044 = vpow2.f32 %v602_v36  ;;  %1041 = vset.pattern.permute.xlu2 %v1197_v35 }
 0x159   : > { %1046 = vpow2.f32 %v604_v37 }
 0x15e   : > { %v1045_v38 = vpop.eup %1044 }
 0x15f   : > { %v1047_v39 = vpop.eup %1046  ;;  %v606_v40 = vsel %vm594_vm1, %v1045_v38, 0.0  ;;  %v612_v41 = vperm.slane %v1045_v38, 0 }
 0x160   : > { %v607_v42 = vsel %vm594_vm1, %v1047_v39, 0.0  ;;  %v613_v43 = vperm.slane %v1047_v39, 0 }
 0x161   : > { %v608_v44 = vadd.f32 %v607_v42, %v606_v40  ;;  %v616_v45 = vmul.f32 %v612_v41, %v1409_v2  ;;  %v614_v48 = vmul.f32 %v612_v41, %v1407_v1 }
 0x162   : > { %v617_v46 = vmul.f32 %v613_v43, %v1415_v5  ;;  %v615_v49 = vmul.f32 %v613_v43, %v1411_v3  ;;  %v486_v43 = vld [vmem:[%s1534_s6] sm:$0xf] }
 0x163   : > { %609 = vadd.xlane.f32.xlu0 %v608_v44 }
 0x164   : > { %v621_v47 = vadd.f32 %v617_v46, %v616_v45  ;;  %v618_v50 = vadd.f32 %v615_v49, %v614_v48  ;;  %v487_v45 = vld [vmem:[%s1535_s7] sm:$0xf] }
 0x165   : > { %v488_v49 = vld [vmem:[%s1536_s8] sm:$0xff] }
 0x166   : > { %622 = vadd.xlane.f32.xlu1 %v621_v47 }
 0x16e   : > { %619 = vadd.xlane.f32.xlu1 %v618_v50  ;;  %v489_v50 = vld [vmem:[%s1536_s8 + $0x8] sm:$0xff] }
 0x177   : > { %749 = vperm.xlu0 %1042, %v492_v33  }
 0x187   : > { %754 = vperm.xlu1 %1043, %v493_v34  }
 0x1d6   : > { %v610_v51 = vpop.xlane.xlu0 %609 }
 0x1d7   : > { %1048 = vrcp.f32 %v610_v51  ;;  %v591_v51 = vpop.f32.mrf.mxu3 }
 0x1d8   : > { %1050 = vrcp.f32 %v1196_v59 }
 0x1d9   : > { %v623_v52 = vpop.xlane.xlu1 %622 }
 0x1dd   : > { %v1049_v53 = vpop.eup %1048 }
 0x1de   : > { %v624_v54 = vperm.slane %v1049_v53, 0  ;;  %v1051_v61 = vpop.eup %1050 }
 0x1df   : > { %v659_v62 = vmul.f32 4.0, %v1051_v61  ;;  %vm663_vm3 = vweird.f32 %v1051_v61 }
 0x1e0   : > { %v626_v55 = vmul.f32 %v624_v54, %v623_v52  ;;  %v490_v52 = vld [vmem:[%s1537_s9] sm:$0xff] }
 0x1e1   : > { %v620_v56 = vpop.xlane.xlu1 %619  ;;  %v660_v6 = vsub.f32 1.0, %v659_v62 }
 0x1e2   : > { %v625_v57 = vmul.f32 %v624_v54, %v620_v56  ;;  %644 = vmatpush.msrb.mxu2 %v626_v55  ;;  %v491_v55 = vld [vmem:[%s1537_s9 + $0x8] sm:$0xff] }
 0x1e3   : > { %v661_v9 = vmul.f32 %v1051_v61, %v660_v6 }
 0x1e4   : > { %645 = vmatpush.msrb.mxu2 %v625_v57 }
 0x1e5   : > { %968 = vmatmul.msk.f32.vlgmr.msrb.gmra.mxu2 %vm513_vm0, %v484_v58  ;;  %v662_v12 = vadd.f32 %v1051_v61, %v661_v9  ;;  %v494_v58 = vld [vmem:[#allocation2] sm:$0x1] }
 0x1e7   : > { %v664_v15 = vsel %vm663_vm3, %v1051_v61, %v662_v12 }
 0x268   : > { %v647_v0 = vpop.f32.mrf.mxu2 }
 0x269   : > { %v648_v4 = vadd.f32 %v647_v0, %v485_v63  ;;  %v727_v63 = vadd.f32 %v1454_v60, %v1436_v23  ;;  %v728_v0 = vadd.f32 %v591_v51, %v1440_v25 }
 0x26b   : > { %v651_v7 = vsel %vm650_vm2, %v648_v4, 0.0 }
 0x26c   : > { %v652_v8 = vrot.slane %v651_v7, 4 }
 0x26e   : > { %v653_v10 = vadd.f32 %v652_v8, %v651_v7 }
 0x270   : > { %v654_v11 = vrot.slane %v653_v10, 2 }
 0x272   : > { %v655_v13 = vadd.f32 %v654_v11, %v653_v10  ;;  %v750_v10 = vpop.permute.xlu0 %749  ;;  %v755_v11 = vpop.permute.xlu1 %754 }
 0x274   : > { %v656_v14 = vrot.slane %v655_v13, 1 }
 0x276   : > { %v657_v16 = vadd.f32 %v656_v14, %v655_v13 }
 0x278   : > { %v665_v17 = vmul.f32 %v664_v15, %v657_v16 }
 0x27a   : > { %v666_v18 = vsub.f32 %v648_v4, %v665_v17 }
 0x27c   : > { %v667_v19 = vmul.f32 %v666_v18, %v666_v18 }
 0x27e   : > { %v668_v20 = vsel %vm650_vm2, %v667_v19, 0.0 }
 0x27f   : > { %v669_v22 = vrot.slane %v668_v20, 4 }
 0x281   : > { %v670_v26 = vadd.f32 %v669_v22, %v668_v20 }
 0x283   : > { %v671_v27 = vrot.slane %v670_v26, 2 }
 0x285   : > { %v672_v28 = vadd.f32 %v671_v27, %v670_v26 }
 0x287   : > { %v673_v29 = vrot.slane %v672_v28, 1 }
 0x289   : > { %v674_v30 = vadd.f32 %v673_v29, %v672_v28 }
 0x28b   : > { %v675_v31 = vmul.f32 %v674_v30, %v664_v15 }
 0x28d   : > { %v676_v32 = vadd.f32 1e-05, %v675_v31 }
 0x28f   : > { %1052 = vrsqrt.f32 %v676_v32  ;;  %vm683_vm5 = vweird.f32 %v676_v32 }
 0x295   : > { %v1053_v36 = vpop.eup %1052 }
 0x296   : > { %v678_v37 = vmul.f32 %v1053_v36, %v676_v32  ;;  %vm684_vm4 = vweird.f32 %v1053_v36 }
 0x297   : > { %vm685_vm6 = vmor %vm683_vm5, %vm684_vm4 }
 0x298   : > { %v679_v38 = vmul.f32 %v1053_v36, %v678_v37 }
 0x29a   : > { %v680_v39 = vmul.f32 0.5, %v679_v38 }
 0x29c   : > { %v681_v40 = vsub.f32 1.5, %v680_v39 }
 0x29e   : > { %v682_v41 = vmul.f32 %v1053_v36, %v681_v40 }
 0x2a0   : > { %v686_v42 = vsel %vm685_vm6, %v1053_v36, %v682_v41 }
 0x2a1   : > { %v687_v44 = vmul.f32 %v686_v42, %v666_v18 }
 0x2a3   : > { %v688_v46 = vmul.f32 %v687_v44, %v486_v43 }
 0x2a5   : > { %v689_v47 = vadd.f32 %v688_v46, %v487_v45 }
 0x2a7   : > { %v690_v48 = vmax.f32 %v689_v47, 0.0 }
 0x2a9   : > { %969 = vmatpush.msk.msrb.mxu3 %vm698_vm7, %v690_v48 }
 0x2aa   : > { %970 = vmatmul.msk.f32.vlgmr.msrb.gmra.mxu3 %vm691_vm8, %v488_v49 }
 0x2b2   : > { %971 = vmatmul.msk.f32.gmra.mxu3 %vm691_vm8, %v489_v50 }
 0x32d   : > { %v719_v53 = vpop.f32.mrf.mxu3 }
 0x32e   : > { %v720_v54 = vadd.f32 %v719_v53, %v490_v52 }
 0x330   : > { %731 = vperm.xlu2 %1041, %v720_v54  }
 0x335   : > { %v722_v56 = vpop.f32.mrf.mxu3 }
 0x336   : > { %v723_v57 = vadd.f32 %v722_v56, %v491_v55 }
 0x338   : > { %736 = vperm.xlu2 %1041, %v723_v57  }
 0x340   : > { %777 = vperm.xlu2 %1041, %v494_v58  }
 0x38a   : > { %v732_v59 = vpop.permute.xlu2 %731 }
 0x38b   : > { %v739_v61 = vadd.f32 %v732_v59, %v1434_v21  ;;  %v740_v62 = vadd.f32 %v732_v59, %v1438_v24 }
 0x38d   : > { %v743_v6 = vmax.f32 %v739_v61, 0.0  ;;  %v744_v7 = vmax.f32 %v740_v62, 0.0 }
 0x38f   : > { %v757_v14 = vmul.f32 %v750_v10, %v743_v6  ;;  %v758_v15 = vmul.f32 %v750_v10, %v744_v7 }
 0x392   : > { %v737_v4 = vpop.permute.xlu2 %736 }
 0x393   : > { %v741_v8 = vadd.f32 %v737_v4, %v727_v63  ;;  %v742_v9 = vadd.f32 %v737_v4, %v728_v0 }
 0x395   : > { %v745_v12 = vmax.f32 %v741_v8, 0.0  ;;  %v746_v13 = vmax.f32 %v742_v9, 0.0 }
 0x397   : > { %v759_v16 = vmul.f32 %v755_v11, %v745_v12  ;;  %v760_v21 = vmul.f32 %v755_v11, %v746_v13 }
 0x399   : > { %v761_v17 = vadd.f32 %v759_v16, %v757_v14  ;;  %v768_v24 = vadd.f32 %v760_v21, %v758_v15 }
 0x39a   : > { %v778_v27 = vpop.permute.xlu2 %777 }
 0x39b   : > { %v762_v18 = vrot.slane %v761_v17, 4  ;;  %v769_v19 = vrot.slane %v768_v24, 4  ;;  %v780_v32 = vperm.slane %v778_v27, 0 }
 0x39d   : > { %v763_v23 = vadd.f32 %v762_v18, %v761_v17  ;;  %v770_v60 = vadd.f32 %v769_v19, %v768_v24 }
 0x39f   : > { %v764_v25 = vrot.slane %v763_v23, 2  ;;  %v771_v20 = vrot.slane %v770_v60, 2 }
 0x3a1   : > { %v765_v22 = vadd.f32 %v764_v25, %v763_v23  ;;  %v772_v26 = vadd.f32 %v771_v20, %v770_v60 }
 0x3a3   : > { %v766_v28 = vrot.slane %v765_v22, 1  ;;  %v773_v29 = vrot.slane %v772_v26, 1 }
 0x3a5   : > { %v767_v30 = vadd.f32 %v766_v28, %v765_v22  ;;  %v774_v31 = vadd.f32 %v773_v29, %v772_v26 }
 0x3a7   : > { %v781_v33 = vadd.f32 %v780_v32, %v767_v30  ;;  %v782_v34 = vadd.f32 %v780_v32, %v774_v31 }
 0x3a9   : > { %v972_v35 = vmul.f32 -1.442695, %v781_v33  ;;  %v973_v36 = vmul.f32 -1.442695, %v782_v34 }
 0x3ab   : > { %1054 = vpow2.f32 %v972_v35 }
 0x3ac   : > { %1056 = vpow2.f32 %v973_v36 }
 0x3b1   : > { %v1055_v37 = vpop.eup %1054 }
 0x3b2   : > { %v1057_v38 = vpop.eup %1056  ;;  %v789_v39 = vadd.f32 1.0, %v1055_v37 }
 0x3b3   : > { %v790_v40 = vadd.f32 1.0, %v1057_v38 }
 0x3b4   : > { %1058 = vrcp.f32 %v789_v39  ;;  %v802_v46 = vand.u32 2147483648, %v789_v39  ;;  %v800_v49 = vand.u32 2147483647, %v789_v39  ;;  %vm796_vm11 = vweird.f32 %v789_v39 }
 0x3b5   : > { %1060 = vrcp.f32 %v790_v40  ;;  %v817_v50 = vand.u32 2147483648, %v790_v40  ;;  %v815_v52 = vand.u32 2147483647, %v790_v40  ;;  %vm811_vm13 = vweird.f32 %v790_v40 }
 0x3b6   : > { %v803_v54 = vor.u32 1.1754944e-38, %v802_v46  ;;  %vm801_vm14 = vcmp.eq.f32.partialorder %v800_v49, 8.507059e+37 }
 0x3b7   : > { %v818_v57 = vor.u32 1.1754944e-38, %v817_v50  ;;  %vm816_vm0 = vcmp.eq.f32.partialorder %v815_v52, 8.507059e+37 }
 0x3ba   : > { %v1059_v41 = vpop.eup %1058 }
 0x3bb   : > { %v1061_v42 = vpop.eup %1060  ;;  %v792_v43 = vmul.f32 %v1059_v41, %v789_v39  ;;  %vm797_vm9 = vweird.f32 %v1059_v41 }
 0x3bc   : > { %v807_v44 = vmul.f32 %v1061_v42, %v790_v40  ;;  %vm812_vm10 = vweird.f32 %v1061_v42  ;;  %vm798_vm12 = vmor %vm796_vm11, %vm797_vm9 }
 0x3bd   : > { %v793_v45 = vsub.f32 1.0, %v792_v43  ;;  %vm813_vm15 = vmor %vm811_vm13, %vm812_vm10 }
 0x3be   : > { %v808_v47 = vsub.f32 1.0, %v807_v44 }
 0x3bf   : > { %v794_v48 = vmul.f32 %v1059_v41, %v793_v45 }
 0x3c0   : > { %v809_v51 = vmul.f32 %v1061_v42, %v808_v47 }
 0x3c1   : > { %v795_v53 = vadd.f32 %v1059_v41, %v794_v48 }
 0x3c2   : > { %v810_v55 = vadd.f32 %v1061_v42, %v809_v51 }
 0x3c3   : > { %v799_v56 = vsel %vm798_vm12, %v1059_v41, %v795_v53 }
 0x3c4   : > { %v804_v58 = vsel %vm801_vm14, %v803_v54, %v799_v56  ;;  %v814_v59 = vsel %vm813_vm15, %v1061_v42, %v810_v55 }
 0x3c5   : > { %v819_v61 = vsel %vm816_vm0, %v818_v57, %v814_v59  ;;  %v821_v62 = vmul.f32 %v804_v58, %v1407_v1  ;;  %v823_v63 = vmul.f32 %v804_v58, %v1409_v2 }
 0x3c6   : > { %v822_v0 = vmul.f32 %v819_v61, %v1411_v3  ;;  %v824_v4 = vmul.f32 %v819_v61, %v1415_v5 }
 0x3c7   : > { %825 = vst [vmem:[%s477_s12] sm:$0xff] %v821_v62 }
 0x3c8   : > { %826 = vst [vmem:[%s477_s12 + $0x8] sm:$0xff] %v822_v0 }
 0x3c9   : > { %827 = vst [vmem:[%s477_s12 + $0x10] sm:$0xff] %v823_v63 }
 0x3ca   : > { %828 = vst [vmem:[%s477_s12 + $0x18] sm:$0xff] %v824_v4 }
 0x3cb   : > { %1149 = shalt.err (!%p1146_p0)
}
 0x3cc   : > { %s1198_s0 = smov 256   ;;  %s1199_s29 = smov 16  }
 0x3cd   : > { %988 = dma.vmem_to_hbm [thread:$0]  (%p1318_p11), %s843_s23, 512, %s845_s25, %s830_s16, %s1198_s0, %s1198_s0, %s1199_s29  }
 0x3ce PF: > { %s1573_s21 = sld [smem:[#allocation12_spill]]  ;;  %p1575_p1 = scmp.ge.s32.totalorder %s1192_s26, 2 }
 0x3d0   : > { %p998_p4 = pnand %p1575_p1, %p1322_p12 }
 0x3d2   : > { %p999_p7 = pneg %p998_p4 }
 0x3d4   : > { %s859_s14 = sand.u32 1, %s1573_s21  }
 0x3d5   : > { %s860_s22 = scalar_lea.sflag [#allocation5], %s859_s14 }
 0x3d6   : > { %1175 = dma.done.wait (%p999_p7), %s860_s22, 512  }
 0x3d7   : > { %1177 = vsyncadd (%p999_p7), %s860_s22, 4294966784  ;;  %s1576_s26 = sld [smem:[#allocation15_spill]]  ;;  %s1579_s23 = smov %s1184_s24 }
 0x3d8   : > { %s1577_s12 = sld [smem:[#allocation13_spill]] }
 0x3d9   : > { %s1578_s25 = sld [smem:[#allocation16_spill]] }
 0x3dd   : > { %p30_p5 = scmp.ge.s32.totalorder %s1576_s26, 4  }
 0x3de   : > { %s1580_s24 = smov %s1577_s12 }
 0x3df   :  { %32 = sbr.rel (!%p30_p5) target bundleno = 10 (0xa), region = 126 }
 0x3e4   :  { %866 = vsyncpa [#allocation4], 1 }
 0x3e5   :  { %868 = vsyncpa [#allocation4 + $0x1], 1 }
 0x3e6   :  { %869 = vsyncpa [#allocation7], 1 }
 0x3e7   :  { %871 = vsyncpa [#allocation7 + $0x1], 1 }
 0x3e8   :  { %872 = vsyncpa [#allocation5], 1 }
 0x3e9   :  { %874 = vsyncpa [#allocation5 + $0x1], 1 }

</bundles_post_ra>
